<compile_context>
chip_gen: v6e
topology: v6e:2x2x1
jax: 0.10.0
libtpu: 0.0.40
codegen_flags: <defaults>
</compile_context>

<pallas_src>
import functools
import math

import jax
import jax.numpy as jnp
from jax.experimental import pallas as pl
from jax.experimental.pallas import tpu as pltpu

# ----------------------------- static config --------------------------------

HIDDEN = 32           # config.hidden_size (small synthetic)
HALF = HIDDEN // 2
VOCAB = 256           # config.vocab_size (small synthetic, lane-dense)
NUM_HASHTAGS = 128    # config.num_hashtag_types (small synthetic)
NUM_METRICS = 4       # likes + shares + comments + reach
LN_EPS = 1e-5

# MXU operand dtype.  Set to jnp.float32 for exact f32 parity with PyTorch;
# bf16 halves weight DMA and doubles MXU throughput.  LayerNorm / GELU /
# sigmoid / exp and all accumulation stay in f32 (v5e VPU/EUP have no bf16).
MXU_DTYPE = jnp.bfloat16
# Generation logits dtype.  bf16 halves the M*V output writeback that dominates
# HBM traffic at realistic vocab sizes (biggest win on v5e, smallest on v7x).
# Set to jnp.float32 for exact output-dtype parity with the PyTorch module.
GEN_LOGITS_DTYPE = jnp.bfloat16

# CLS-head packing layout: (name, mid_dim, out_dim, final_activation).
# Engagement goes first so its extra LayerNorm acts on a leading column block.
HEAD_SPECS = (
    ("engagement_prediction", HIDDEN, NUM_METRICS,  "exp"),
    ("sentiment_analysis",    HALF,   3,            "none"),
    ("hashtag_suggestion",    HIDDEN, NUM_HASHTAGS, "none"),
    ("viral_potential",       HALF,   1,            "sigmoid100"),
    ("audience_targeting",    HIDDEN, 10,           "none"),
    ("topic_classification",  HALF,   20,           "none"),
)


def _round_up(n, m):
    return ((n + m - 1) // m) * m


_MID_OFFS, _OUT_OFFS = {}, {}
_m, _o = 0, 0
for _name, _mdim, _odim, _act in HEAD_SPECS:
    _MID_OFFS[_name] = (_m, _mdim)
    _OUT_OFFS[_name] = (_o, _odim)
    _m += _mdim
    _o += _odim
MID_PAD = _round_up(_m, 128)   # 144 -> 256 (lane-dense packed intermediate)
OUT_PAD = _round_up(_o, 128)   # 166 -> 256 (lane-dense packed output slab)

ENG_MID_OFF, ENG_MID_DIM = _MID_OFFS["engagement_prediction"]
ENG_OUT_OFF, ENG_OUT_DIM = _OUT_OFFS["engagement_prediction"]
VIRAL_OUT_OFF, VIRAL_OUT_DIM = _OUT_OFFS["viral_potential"]
assert ENG_MID_OFF == 0  # kernel's masked engagement LN assumes the segment starts at col 0


def _layernorm(x, gamma, beta, eps=LN_EPS):
    mu = jnp.mean(x, axis=-1, keepdims=True)
    var = jnp.mean(jnp.square(x - mu), axis=-1, keepdims=True)
    return (x - mu) * jax.lax.rsqrt(var + eps) * gamma + beta


# --------------------------- generation kernel -------------------------------

def _gen_kernel(x_ref, g_ref, b_ref, w_ref, bias_ref, o_ref, xn_ref):
    # Grid = (row_tiles, vocab_tiles), rows outer.  The normalized + bf16-cast
    # row tile is computed ONCE per row tile (vocab step 0) into the VMEM
    # scratch and reused across the entire vocab sweep; the x tile itself is
    # only DMA'd once because its block index is constant along the inner axis.
    @pl.when(pl.program_id(1) == 0)
    def _():
        x = x_ref[...].astype(jnp.float32)
        xn_ref[...] = _layernorm(x, g_ref[...], b_ref[...]).astype(MXU_DTYPE)

    out = jnp.dot(xn_ref[...], w_ref[...],
                  preferred_element_type=jnp.float32) + bias_ref[...]
    o_ref[...] = out.astype(o_ref.dtype)


def generation_head(hidden_states, ln_g, ln_b, w_mxu, b):
    """hidden_states: [B, S, H] -> logits [B, S, V] in GEN_LOGITS_DTYPE."""
    B, S, H = hidden_states.shape
    V = w_mxu.shape[1]
    M = B * S
    x2d = hidden_states.reshape(M, H)        # contiguous, free reshape

    # Tile caps sized so 2x(double-buffered x/weight/logit tiles) + scratch
    # stays well under v5e's 16 MiB scoped-VMEM default and v7x's 64 MiB
    # physical VMEM even at realistic H.  The synthetic shapes (M=16, V=256)
    # stay single-step: this stage is launch/DMA-latency bound and extra grid
    # steps would only add ~0.35us/step pipeline overhead.
    bm = M if M <= 256 else 256
    bn = V if V <= 512 else 512
    # Rows outer ("parallel": v7x megacore shards row tiles at realistic M);
    # vocab inner must be "arbitrary" because the xn scratch is carried across
    # vocab steps (filled only at vocab step 0).
    grid = (pl.cdiv(M, bm), pl.cdiv(V, bn))

    out = pl.pallas_call(
        _gen_kernel,
        out_shape=jax.ShapeDtypeStruct((M, V), GEN_LOGITS_DTYPE),
        grid=grid,
        in_specs=[
            pl.BlockSpec((bm, H), lambda i, j: (i, 0)),
            pl.BlockSpec((1, H), lambda i, j: (0, 0)),
            pl.BlockSpec((1, H), lambda i, j: (0, 0)),
            pl.BlockSpec((H, bn), lambda i, j: (0, j)),
            pl.BlockSpec((1, bn), lambda i, j: (0, j)),
        ],
        out_specs=pl.BlockSpec((bm, bn), lambda i, j: (i, j)),
        scratch_shapes=[pltpu.VMEM((bm, H), MXU_DTYPE)],
        compiler_params=pltpu.CompilerParams(
            dimension_semantics=("parallel", "arbitrary")),
    )(x2d, ln_g, ln_b, w_mxu, b)
    return out.reshape(B, S, V)


# ------------------------ fused CLS multi-head kernel -------------------------

def _cls_fused_kernel(cls_ref, g_ref, b_ref, w1_ref, b1_ref,
                      eg_ref, eb_ref, w2_ref, b2_ref, o_ref):
    # cls_ref: (B, H) CLS rows only (sliced in the wrapper; no full-sequence DMA).
    x = cls_ref[...].astype(jnp.float32)
    xn = _layernorm(x, g_ref[...], b_ref[...])                 # shared outer LN (f32)

    # First matmul of ALL six heads at once (W1s concatenated along out dim).
    h1 = jnp.dot(xn.astype(MXU_DTYPE), w1_ref[...],
                 preferred_element_type=jnp.float32) + b1_ref[...]
    # Exact erf GELU matches torch nn.GELU(); on v5e (single EUP, no bf16 path)
    # approximate=True (tanh) would be cheaper if exact parity is not required.
    h1 = jax.nn.gelu(h1, approximate=False)

    # Engagement head's extra LayerNorm on its mid segment (cols [0, HIDDEN)),
    # done as a masked blend: no sub-128-lane slice / concatenate, so no VMEM
    # copies or XLU relayouts -- pure VPU/EUP-slot work.
    col = jax.lax.broadcasted_iota(jnp.int32, h1.shape, 1)
    eng_cols = col < ENG_MID_DIM                               # ENG_MID_OFF == 0
    inv_n = 1.0 / ENG_MID_DIM
    mu = jnp.sum(jnp.where(eng_cols, h1, 0.0), axis=-1, keepdims=True) * inv_n
    d = jnp.where(eng_cols, h1 - mu, 0.0)
    var = jnp.sum(d * d, axis=-1, keepdims=True) * inv_n
    eng_norm = (h1 - mu) * jax.lax.rsqrt(var + LN_EPS) * eg_ref[...] + eb_ref[...]
    h1 = jnp.where(eng_cols, eng_norm, h1)
    # (dropout layers are identity in eval mode)

    # Second matmul of ALL heads: block-diagonal packed W2 (zero off-blocks).
    out = jnp.dot(h1.astype(MXU_DTYPE), w2_ref[...],
                  preferred_element_type=jnp.float32) + b2_ref[...]

    # Per-head final activations via lane masks.  exp/sigmoid are evaluated on
    # the whole slab: non-selected lanes may overflow to +inf but jnp.where
    # discards them safely.  Do NOT rewrite as multiply-by-mask (inf*0 = NaN).
    ocol = jax.lax.broadcasted_iota(jnp.int32, out.shape, 1)
    eng_mask = (ocol >= ENG_OUT_OFF) & (ocol < ENG_OUT_OFF + ENG_OUT_DIM)
    vir_mask = (ocol >= VIRAL_OUT_OFF) & (ocol < VIRAL_OUT_OFF + VIRAL_OUT_DIM)
    out = jnp.where(eng_mask, jnp.exp(out),
                    jnp.where(vir_mask, jax.nn.sigmoid(out) * 100.0, out))
    o_ref[...] = out.astype(o_ref.dtype)                       # lane-dense store


def cls_heads_fused(cls_tokens, p):
    """All six CLS heads in ONE gridless pallas_call -> (B, OUT_PAD) slab."""
    B = cls_tokens.shape[0]
    operands = (cls_tokens, p["ln_g"], p["ln_b"], p["w1_cat"], p["b1_cat"],
                p["eng_ln_g_pad"], p["eng_ln_b_pad"], p["w2_blk"], p["b2_cat"])
    vmem = functools.partial(pl.BlockSpec, memory_space=pltpu.MemorySpace.VMEM)
    return pl.pallas_call(
        _cls_fused_kernel,
        out_shape=jax.ShapeDtypeStruct((B, OUT_PAD), jnp.float32),
        # No grid: single invocation, all (tiny) operands resident in VMEM --
        # avoids any pipeline prologue/epilogue for this latency-bound stage.
        in_specs=[vmem() for _ in operands],
        out_specs=vmem(),
    )(*operands)


# ------------------------- parameter initialization --------------------------

def _linear_params(key, fan_in, fan_out):
    kw, kb = jax.random.split(key)
    bound = 1.0 / math.sqrt(fan_in)
    w = jax.random.uniform(kw, (fan_in, fan_out), jnp.float32, -bound, bound)
    b = jax.random.uniform(kb, (1, fan_out), jnp.float32, -bound, bound)
    return w, b


def _ln_params(key, dim):
    kg, kb = jax.random.split(key)
    g = 1.0 + 0.02 * jax.random.normal(kg, (1, dim), jnp.float32)
    b = 0.02 * jax.random.normal(kb, (1, dim), jnp.float32)
    return g, b


def init_params(key):
    keys = jax.random.split(key, 3 + len(HEAD_SPECS))
    p = {}
    p["ln_g"], p["ln_b"] = _ln_params(keys[0], HIDDEN)       # outer layer_norm
    p["gen_w"], p["gen_b"] = _linear_params(keys[1], HIDDEN, VOCAB)
    p["eng_ln_g"], p["eng_ln_b"] = _ln_params(keys[2], HIDDEN)

    heads = {}
    for i, (name, mdim, odim, _act) in enumerate(HEAD_SPECS):
        k1, k2 = jax.random.split(keys[3 + i])
        w1, b1 = _linear_params(k1, HIDDEN, mdim)
        w2, b2 = _linear_params(k2, mdim, odim)
        heads[name] = dict(w1=w1, b1=b1, w2=w2, b2=b2)
    p["heads"] = heads

    # Packed / MXU-ready parameters for the fused CLS kernel.
    w1_cat = jnp.zeros((HIDDEN, MID_PAD), jnp.float32)
    b1_cat = jnp.zeros((1, MID_PAD), jnp.float32)
    w2_blk = jnp.zeros((MID_PAD, OUT_PAD), jnp.float32)
    b2_cat = jnp.zeros((1, OUT_PAD), jnp.float32)
    for name, mdim, odim, _act in HEAD_SPECS:
        moff, _ = _MID_OFFS[name]
        ooff, _ = _OUT_OFFS[name]
        h = heads[name]
        w1_cat = w1_cat.at[:, moff:moff + mdim].set(h["w1"])
        b1_cat = b1_cat.at[:, moff:moff + mdim].set(h["b1"])
        w2_blk = w2_blk.at[moff:moff + mdim, ooff:ooff + odim].set(h["w2"])
        b2_cat = b2_cat.at[:, ooff:ooff + odim].set(h["b2"])
    p["w1_cat"] = w1_cat.astype(MXU_DTYPE)
    p["b1_cat"] = b1_cat
    p["w2_blk"] = w2_blk.astype(MXU_DTYPE)
    p["b2_cat"] = b2_cat
    # Engagement-LN params padded to the packed intermediate width so the
    # kernel's masked LN can broadcast them directly (pad values are irrelevant
    # since non-engagement columns are blended back from the original h1).
    p["eng_ln_g_pad"] = jnp.ones((1, MID_PAD), jnp.float32).at[:, :HIDDEN].set(p["eng_ln_g"])
    p["eng_ln_b_pad"] = jnp.zeros((1, MID_PAD), jnp.float32).at[:, :HIDDEN].set(p["eng_ln_b"])
    p["gen_w_mxu"] = p["gen_w"].astype(MXU_DTYPE)
    return p


# ------------------------------- forward -------------------------------------

@functools.partial(jax.jit, static_argnames=("task",))
def social_llm_output_heads_forward(params, hidden_states, task):
    if task == "generation":
        return generation_head(hidden_states, params["ln_g"], params["ln_b"],
                               params["gen_w_mxu"], params["gen_b"])
    if task not in _OUT_OFFS:
        raise ValueError(f"Task {task} not supported.")
    # CLS token hard-coded at sequence position 0 (matches the reference
    # module).  Wrapper-side slice so the fused kernel only DMAs (B, H) bytes
    # instead of the full (B, S, H) hidden_states.
    cls_tokens = hidden_states[:, 0]
    packed = cls_heads_fused(cls_tokens, params)
    off, dim = _OUT_OFFS[task]
    return packed[:, off:off + dim]


# ------------------------------ reference ------------------------------------

def _ref_forward(params, hidden_states, task, mxu_dtype):
    """Plain-JAX reference; mxu_dtype mirrors the kernel's matmul precision."""
    def mm(a, w):
        return jnp.dot(a.astype(mxu_dtype), w.astype(mxu_dtype),
                       preferred_element_type=jnp.float32)

    xn = _layernorm(hidden_states.astype(jnp.float32),
                    params["ln_g"][0], params["ln_b"][0])
    if task == "generation":
        return mm(xn, params["gen_w"]) + params["gen_b"]
    cls = xn[:, 0]
    h = params["heads"][task]
    x = jax.nn.gelu(mm(cls, h["w1"]) + h["b1"], approximate=False)
    if task == "engagement_prediction":
        x = _layernorm(x, params["eng_ln_g"][0], params["eng_ln_b"][0])
    out = mm(x, h["w2"]) + h["b2"]
    if task == "viral_potential":
        out = jax.nn.sigmoid(out) * 100.0
    elif task == "engagement_prediction":
        out = jnp.exp(out)
    return out


# -------------------------------- main ---------------------------------------

if __name__ == "__main__":
    key = jax.random.PRNGKey(0)
    kp, kx = jax.random.split(key)
    params = init_params(kp)

    B, S = 2, 8
    hidden_states = jax.random.normal(kx, (B, S, HIDDEN), jnp.float32)

    tasks = ["generation", "sentiment_analysis", "engagement_prediction",
             "topic_classification", "hashtag_suggestion", "viral_potential",
             "audience_targeting"]

    ok = True
    for task in tasks:
        out = social_llm_output_heads_forward(params, hidden_states, task)
        out = jax.block_until_ready(out)
        ref_mixed = _ref_forward(params, hidden_states, task, MXU_DTYPE)
        ref_f32 = _ref_forward(params, hidden_states, task, jnp.float32)
        if out.shape != ref_f32.shape:
            ok = False
        # Tight check against a reference with identical MXU precision
        # (tolerance covers the bf16 logits store).
        if not jnp.allclose(out.astype(jnp.float32), ref_mixed,
                            atol=2e-2, rtol=2e-2):
            ok = False
        # Loose sanity check against the exact f32 module semantics.
        if not jnp.allclose(out.astype(jnp.float32), ref_f32,
                            atol=1.5e-1, rtol=1e-1):
            ok = False

    if ok:
        print("KERNEL_OK")
</pallas_src>

<mosaic_0001>
module attributes {stable_mosaic.version = 11 : i64} {
  func.func @_gen_kernel(%arg0: i32, %arg1: i32, %arg2: memref<16x32xf32, #tpu.memory_space<vmem>>, %arg3: memref<1x32xf32, #tpu.memory_space<vmem>>, %arg4: memref<1x32xf32, #tpu.memory_space<vmem>>, %arg5: memref<32x256xbf16, #tpu.memory_space<vmem>>, %arg6: memref<1x256xf32, #tpu.memory_space<vmem>>, %arg7: memref<16x256xbf16, #tpu.memory_space<vmem>>, %arg8: memref<16x32xbf16, #tpu.memory_space<vmem>>) attributes {dimension_semantics = [#tpu.dimension_semantics<parallel>, #tpu.dimension_semantics<arbitrary>], iteration_bounds = array<i64: 1, 1>, scalar_prefetch = 0 : i64, scratch_operands = 1 : i64, tpu.core_type = #tpu.core_type<tc>, window_params = [{transform_indices = @transform_0, window_bounds = array<i64: 16, 32>}, {pipeline_mode = #tpu.pipeline_mode<synchronous>, transform_indices = @transform_1, window_bounds = array<i64: 1, 32>}, {pipeline_mode = #tpu.pipeline_mode<synchronous>, transform_indices = @transform_2, window_bounds = array<i64: 1, 32>}, {transform_indices = @transform_3, window_bounds = array<i64: 32, 256>}, {transform_indices = @transform_4, window_bounds = array<i64: 1, 256>}, {transform_indices = @transform_5, window_bounds = array<i64: 16, 256>}]} {
    %c0_i32 = arith.constant 0 : i32
    %0 = arith.cmpi eq, %arg1, %c0_i32 : i32
    %1 = arith.extui %0 : i1 to i32
    %c0_i32_0 = arith.constant 0 : i32
    %2 = arith.cmpi ne, %1, %c0_i32_0 : i32
    scf.if %2 {
      %c0_8 = arith.constant 0 : index
      %c0_9 = arith.constant 0 : index
      %11 = vector.load %arg2[%c0_8, %c0_9] : memref<16x32xf32, #tpu.memory_space<vmem>>, vector<16x32xf32>
      %c0_10 = arith.constant 0 : index
      %c0_11 = arith.constant 0 : index
      %12 = vector.load %arg3[%c0_10, %c0_11] : memref<1x32xf32, #tpu.memory_space<vmem>>, vector<1x32xf32>
      %c0_12 = arith.constant 0 : index
      %c0_13 = arith.constant 0 : index
      %13 = vector.load %arg4[%c0_12, %c0_13] : memref<1x32xf32, #tpu.memory_space<vmem>>, vector<1x32xf32>
      %cst_14 = arith.constant dense<0.000000e+00> : vector<16xf32>
      %14 = vector.multi_reduction <add>, %11, %cst_14 [1] : vector<16x32xf32> to vector<16xf32>
      %15 = vector.shape_cast %14 : vector<16xf32> to vector<16x1xf32>
      %cst_15 = arith.constant 3.200000e+01 : f32
      %16 = vector.broadcast %cst_15 : f32 to vector<16x1xf32>
      %17 = arith.divf %15, %16 : vector<16x1xf32>
      %18 = vector.broadcast %17 : vector<16x1xf32> to vector<16x32xf32>
      %19 = arith.subf %11, %18 : vector<16x32xf32>
      %20 = arith.mulf %19, %19 : vector<16x32xf32>
      %cst_16 = arith.constant dense<0.000000e+00> : vector<16xf32>
      %21 = vector.multi_reduction <add>, %20, %cst_16 [1] : vector<16x32xf32> to vector<16xf32>
      %22 = vector.shape_cast %21 : vector<16xf32> to vector<16x1xf32>
      %cst_17 = arith.constant 3.200000e+01 : f32
      %23 = vector.broadcast %cst_17 : f32 to vector<16x1xf32>
      %24 = arith.divf %22, %23 : vector<16x1xf32>
      %25 = vector.broadcast %17 : vector<16x1xf32> to vector<16x32xf32>
      %26 = arith.subf %11, %25 : vector<16x32xf32>
      %cst_18 = arith.constant 9.99999974E-6 : f32
      %27 = vector.broadcast %cst_18 : f32 to vector<16x1xf32>
      %28 = arith.addf %24, %27 : vector<16x1xf32>
      %29 = math.rsqrt %28 : vector<16x1xf32>
      %30 = vector.broadcast %29 : vector<16x1xf32> to vector<16x32xf32>
      %31 = arith.mulf %26, %30 : vector<16x32xf32>
      %32 = vector.broadcast %12 : vector<1x32xf32> to vector<16x32xf32>
      %33 = arith.mulf %31, %32 : vector<16x32xf32>
      %34 = vector.broadcast %13 : vector<1x32xf32> to vector<16x32xf32>
      %35 = arith.addf %33, %34 : vector<16x32xf32>
      %36 = arith.truncf %35 : vector<16x32xf32> to vector<16x32xbf16>
      %c0_19 = arith.constant 0 : index
      %c0_20 = arith.constant 0 : index
      %37 = vector.load %arg8[%c0_19, %c0_20] : memref<16x32xbf16, #tpu.memory_space<vmem>>, vector<16x32xbf16>
      tpu.vector_store %arg8[%c0_19, %c0_20], %36 {strides = array<i32>} : memref<16x32xbf16, #tpu.memory_space<vmem>>, vector<16x32xbf16>,
    } else {
    }
    %c0 = arith.constant 0 : index
    %c0_1 = arith.constant 0 : index
    %3 = vector.load %arg8[%c0, %c0_1] : memref<16x32xbf16, #tpu.memory_space<vmem>>, vector<16x32xbf16>
    %c0_2 = arith.constant 0 : index
    %c0_3 = arith.constant 0 : index
    %4 = vector.load %arg5[%c0_2, %c0_3] : memref<32x256xbf16, #tpu.memory_space<vmem>>, vector<32x256xbf16>
    %cst = arith.constant dense<0.000000e+00> : vector<16x256xf32>
    %5 = tpu.matmul %3, %4, %cst {dimension_numbers = #tpu.dot_dimension_numbers<[1], [0], [0], [1], [0, 0, 1, 1], [], []>} : vector<16x32xbf16>, vector<32x256xbf16>, vector<16x256xf32> -> vector<16x256xf32>
    %c0_4 = arith.constant 0 : index
    %c0_5 = arith.constant 0 : index
    %6 = vector.load %arg6[%c0_4, %c0_5] : memref<1x256xf32, #tpu.memory_space<vmem>>, vector<1x256xf32>
    %7 = vector.broadcast %6 : vector<1x256xf32> to vector<16x256xf32>
    %8 = arith.addf %5, %7 : vector<16x256xf32>
    %9 = arith.truncf %8 : vector<16x256xf32> to vector<16x256xbf16>
    %c0_6 = arith.constant 0 : index
    %c0_7 = arith.constant 0 : index
    %10 = vector.load %arg7[%c0_6, %c0_7] : memref<16x256xbf16, #tpu.memory_space<vmem>>, vector<16x256xbf16>
    tpu.vector_store %arg7[%c0_6, %c0_7], %9 {strides = array<i32>} : memref<16x256xbf16, #tpu.memory_space<vmem>>, vector<16x256xbf16>,
    return
  }
  func.func @transform_0(%arg0: i32, %arg1: i32) -> (i32, i32) {
    %c0_i32 = arith.constant 0 : i32
    %c0_i32_0 = arith.constant 0 : i32
    return %arg0, %c0_i32 : i32, i32
  }
  func.func @transform_1(%arg0: i32, %arg1: i32) -> (i32, i32) {
    %c0_i32 = arith.constant 0 : i32
    %c0_i32_0 = arith.constant 0 : i32
    %c0_i32_1 = arith.constant 0 : i32
    return %c0_i32, %c0_i32_0 : i32, i32
  }
  func.func @transform_2(%arg0: i32, %arg1: i32) -> (i32, i32) {
    %c0_i32 = arith.constant 0 : i32
    %c0_i32_0 = arith.constant 0 : i32
    %c0_i32_1 = arith.constant 0 : i32
    return %c0_i32, %c0_i32_0 : i32, i32
  }
  func.func @transform_3(%arg0: i32, %arg1: i32) -> (i32, i32) {
    %c0_i32 = arith.constant 0 : i32
    %c0_i32_0 = arith.constant 0 : i32
    return %c0_i32, %arg1 : i32, i32
  }
  func.func @transform_4(%arg0: i32, %arg1: i32) -> (i32, i32) {
    %c0_i32 = arith.constant 0 : i32
    %c0_i32_0 = arith.constant 0 : i32
    return %c0_i32, %arg1 : i32, i32
  }
  func.func @transform_5(%arg0: i32, %arg1: i32) -> (i32, i32) {
    %c0_i32 = arith.constant 0 : i32
    return %arg0, %arg1 : i32, i32
  }
}

</mosaic_0001>

<bundles_post_ra>
// kernel: social_llm_output_heads_forward.1
= control target key start
LH: loop header
LB: loop body
LE: loop exit
PB: predicated region body
PF: predicated region fallthrough
CT: control target
= control target key end

     0   :  { %10 = vsyncpa [#allocation4], 0  ;;  %s435_s0 = inlined_call_operand.hbm [shape: f32[16,32], index: 0, kind: input, shape index: {}]   ;;  %s436_s1 = inlined_call_operand.vmem [shape: f32[1,32], index: 1, kind: input, shape index: {}]   ;;  %s437_s2 = inlined_call_operand.vmem [shape: f32[1,32], index: 2, kind: input, shape index: {}]   ;;  %s438_s3 = inlined_call_operand.hbm [shape: bf16[32,256], index: 3, kind: input, shape index: {}]   ;;  %s439_s4 = inlined_call_operand.hbm [shape: f32[1,256], index: 4, kind: input, shape index: {}]   ;;  %s440_s5 = inlined_call_operand.hbm [shape: bf16[16,256], index: 5, kind: output, shape index: {}]  }
   0x1   :  { %11 = vsyncpa [#allocation7], 0 }
   0x2   :  { %12 = vsyncpa [#allocation5], 0  ;;  %s366_s18 = smov [#allocation6]   ;;  %s367_s20 = smov [#allocation3]  }
   0x3   :  { %s34_s19 = sshll.u32 %s366_s18, 4  ;;  %s18_s21 = sshll.u32 %s367_s20, 4  ;;  %s35_s19 = int_to_ptr.vmem [resolvable:$true] %s34_s19  ;;  %s19_s21 = int_to_ptr.vmem [resolvable:$true] %s18_s21 }
   0x4   :  { %s288_s22 = scalar_lea.vmem %s35_s19, 512  ;;  %p293_p1 = scmp.lt.s32.totalorder %s35_s19, %s35_s19 }
   0x5   :  { %p289_p0 = scmp.ne.s32.totalorder %s35_s19, %s288_s22  ;;  %p294_p2 = scmp.lt.s32.totalorder %s288_s22, %s288_s22 }
   0x7   :  { %p295_p3 = por %p294_p2, %p293_p1 }
   0x9   :  { %p296_p4 = pnand %p295_p3, %p289_p0 }
   0xb   :  { %299 = shalt.err (!%p296_p4)
}
   0xc   :  { %s368_s23 = smov 128   ;;  %s369_s24 = smov 8  }
   0xd   :  { %40 = dma.hbm_to_vmem [thread:$0]  %s438_s3, 512, %s35_s19, [#allocation7], %s368_s23, %s368_s23, %s369_s24  }
   0xe   :  { %s308_s27 = scalar_lea.vmem %s19_s21, 256  ;;  %p313_p6 = scmp.lt.s32.totalorder %s19_s21, %s19_s21 }
   0xf   :  { %p309_p5 = scmp.ne.s32.totalorder %s19_s21, %s308_s27  ;;  %p314_p7 = scmp.lt.s32.totalorder %s308_s27, %s308_s27 }
  0x11   :  { %p315_p8 = por %p314_p7, %p313_p6 }
  0x13   :  { %p316_p9 = pnand %p315_p8, %p309_p5 }
  0x15   :  { %319 = shalt.err (!%p316_p9)
}
  0x16   :  { %24 = dma.hbm_to_vmem [thread:$0]  %s435_s0, 256, %s19_s21, [#allocation4], %s368_s23, %s368_s23, %s369_s24  }
  0x17   :  { %s370_s30 = smov [#allocation8]  }
  0x18   :  { %s47_s6 = sshll.u32 %s370_s30, 4  ;;  %s48_s6 = int_to_ptr.vmem [resolvable:$true] %s47_s6 }
  0x19   :  { %s328_s7 = scalar_lea.vmem %s48_s6, 32  ;;  %p333_p11 = scmp.lt.s32.totalorder %s48_s6, %s48_s6 }
  0x1a   :  { %p329_p10 = scmp.ne.s32.totalorder %s48_s6, %s328_s7  ;;  %p334_p12 = scmp.lt.s32.totalorder %s328_s7, %s328_s7 }
  0x1c   :  { %p335_p13 = por %p334_p12, %p333_p11 }
  0x1e   :  { %p336_p0 = pnand %p335_p13, %p329_p10 }
  0x20   :  { %339 = shalt.err (!%p336_p0)
}
  0x21   :  { %50 = dma.hbm_to_vmem [thread:$0]  %s439_s4, 32, %s48_s6, [#allocation7]  }
  0x22   :  { %360 = dma.done.wait [#allocation4], 256  }
  0x23   :  { %361 = vsyncadd [#allocation4], 4294967040 }
  0x24   :  { %362 = dma.done.wait [#allocation7], 544  }
  0x25   :  { %363 = vsyncadd [#allocation7], 4294966752  ;;  %vm69_vm0 = vcmask 261120   ;;  %v65_v0 = vld [vmem:[#allocation3] sm:$0xff]  ;;  %v66_v1 = vld [vmem:[#allocation3 + $0x8] sm:$0xff]  ;;  %v371_v18 = vmov 0   ;;  %v132_v38 = vlaneseq }
  0x26   :  { %v70_v2 = vsel %vm69_vm0, %v65_v0, 0.0  ;;  %v73_v3 = vsel %vm69_vm0, %v66_v1, 0.0  ;;  %v269_v14 = vld [vmem:[#allocation6 + $0x14] ss:$8 sps:$4 sm:$0xff]   ;;  %v271_v15 = vld [vmem:[#allocation6 + $0x10] ss:$8 sps:$4 sm:$0xff]   ;;  %203 = vmatprep.mubr.bf16.mxu0 %v371_v18 }
  0x27   :  { %71 = vadd.xlane.f32.xlu0 %v70_v2  ;;  %v272_v16 = vld [vmem:[#allocation6 + $0x4] ss:$8 sps:$4 sm:$0xff]   ;;  %183 = vmatprep.subr.bf16.mxu0 %v269_v14  ;;  %v274_v17 = vld [vmem:[#allocation6] ss:$8 sps:$4 sm:$0xff]   ;;  %vm121_vm1 = vcmask 257024   ;;  %v133_v39 = vshrl.u32 %v132_v38, 7 }
  0x28   :  { %184 = vmatpush1.bf16.msra.mxu0 %v271_v15  ;;  %v246_v26 = vld [vmem:[%s436_s1] ss:$0 sm:$0xff]  ;;  %v130_v42 = vld [vmem:[#allocation8] sm:$0x3]  ;;  %s372_s1 = smov [#allocation9]  }
  0x29   :  { %185 = vmatprep.subr.bf16.mxu0 %v272_v16  ;;  %v247_v28 = vld [vmem:[%s437_s2] ss:$0 sm:$0xff]  ;;  %v134_v40 = vsub.s32 0, %v133_v39  ;;  %v138_v41 = vsub.s32 1, %v133_v39  ;;  %s233_s2 = sshll.u32 %s372_s1, 4  ;;  %s234_s2 = int_to_ptr.vmem [resolvable:$true] %s233_s2 }
  0x2a   :  { %s340_s11 = scalar_lea.vmem %s234_s2, 256  ;;  %p345_p2 = scmp.lt.s32.totalorder %s234_s2, %s234_s2 }
  0x2b   :  { %74 = vadd.xlane.f32.xlu0 %v73_v3  ;;  %v135_v43 = vrot.slane %v130_v42, %v134_v40  ;;  %v139_v44 = vrot.slane %v130_v42, %v138_v41  ;;  %p341_p1 = scmp.ne.s32.totalorder %s234_s2, %s340_s11  ;;  %p346_p3 = scmp.lt.s32.totalorder %s340_s11, %s340_s11 }
  0x2c   :  { %186 = vmatpush1.bf16.msra.mxu0 %v274_v17 }
  0x2d   :  { %p347_p4 = por %p346_p3, %p345_p2 }
  0x2f   :  { %p348_p5 = pnand %p347_p4, %p341_p1 }
  0xb0   :  { %v72_v4 = vpop.xlane.xlu0 %71 }
  0xb1   :  { %v77_v5 = vmul.f32 0.03125, %v72_v4 }
  0xb3   :  { %v79_v6 = vsub.f32 %v65_v0, %v77_v5 }
  0xb4   :  { %v75_v7 = vpop.xlane.xlu0 %74 }
  0xb5   :  { %v78_v8 = vmul.f32 0.03125, %v75_v7  ;;  %v81_v9 = vmul.f32 %v79_v6, %v79_v6 }
  0xb7   :  { %v80_v10 = vsub.f32 %v66_v1, %v78_v8  ;;  %v83_v11 = vsel %vm69_vm0, %v81_v9, 0.0 }
  0xb8   :  { %84 = vadd.xlane.f32.xlu1 %v83_v11 }
  0xb9   :  { %v82_v12 = vmul.f32 %v80_v10, %v80_v10 }
  0xbb   :  { %v86_v13 = vsel %vm69_vm0, %v82_v12, 0.0 }
  0xbc   :  { %87 = vadd.xlane.f32.xlu1 %v86_v13 }
 0x141   :  { %v85_v19 = vpop.xlane.xlu1 %84 }
 0x142   :  { %v89_v20 = vmul.f32 0.03125, %v85_v19 }
 0x144   :  { %v91_v21 = vadd.f32 1e-05, %v89_v20 }
 0x145   :  { %v88_v22 = vpop.xlane.xlu1 %87 }
 0x146   :  { %276 = vrsqrt.f32 %v91_v21  ;;  %v90_v23 = vmul.f32 0.03125, %v88_v22 }
 0x148   :  { %v92_v24 = vadd.f32 1e-05, %v90_v23 }
 0x14a   :  { %278 = vrsqrt.f32 %v92_v24 }
 0x153   :  { %v277_v25 = vpop.eup %276 }
 0x154   :  { %v95_v27 = vmul.f32 %v277_v25, %v79_v6 }
 0x156   :  { %v103_v29 = vmul.f32 %v246_v26, %v95_v27 }
 0x157   :  { %v279_v30 = vpop.eup %278 }
 0x158   :  { %v111_v31 = vadd.f32 %v247_v28, %v103_v29  ;;  %v96_v32 = vmul.f32 %v279_v30, %v80_v10 }
 0x15a   :  { %v258_v33 = vpack.c.bf16 %v111_v31, %v111_v31  ;;  %v104_v34 = vmul.f32 %v246_v26, %v96_v32 }
 0x15c   :  { %122 = vst.msk [vmem:[#allocation2] sm:$0xf] %vm121_vm1, %v258_v33  ;;  %v112_v35 = vadd.f32 %v247_v28, %v104_v34 }
 0x15e   :  { %v259_v36 = vpack.c.bf16 %v112_v35, %v112_v35 }
 0x160   :  { %123 = vst.msk [vmem:[#allocation2 + $0x4] sm:$0xf] %vm121_vm1, %v259_v36 }
 0x167   :  { %v275_v37 = vld [vmem:[#allocation2] sm:$0xff]  }
 0x168   :  { %255 = vmatmul.mubr.msk.bf16.vlgmr.msra.gmra.mxu0 %vm69_vm0, %v275_v37 }
 0x228   :  { %v205_v45 = vpop.f32.mrf.mxu0 }
 0x229   :  { %v206_v47 = vadd.f32 %v205_v45, %v135_v43 }
 0x22a   :  { %v207_v46 = vpop.f32.mrf.mxu0 }
 0x22b   :  { %v208_v48 = vadd.f32 %v207_v46, %v139_v44 }
 0x22c   :  { %v209_v49 = vpop.f32.mrf.mxu0 }
 0x22d   :  { %v260_v50 = vpack.c.bf16 %v208_v48, %v206_v47  ;;  %v210_v52 = vadd.f32 %v209_v49, %v135_v43 }
 0x22e   :  { %v211_v51 = vpop.f32.mrf.mxu0 }
 0x22f   :  { %226 = vst [vmem:[#allocation9] sm:$0xff] %v260_v50  ;;  %v212_v53 = vadd.f32 %v211_v51, %v139_v44 }
 0x231   :  { %v261_v54 = vpack.c.bf16 %v212_v53, %v210_v52 }
 0x233   :  { %227 = vst [vmem:[#allocation9 + $0x8] sm:$0xff] %v261_v54 }
 0x234   :  { %351 = shalt.err (!%p348_p5)
}
 0x235   :  { %239 = dma.vmem_to_hbm [thread:$0]  %s234_s2, 256, %s440_s5, [#allocation5], %s368_s23, %s368_s23, %s369_s24  }
 0x236   :  { %364 = dma.done.wait [#allocation5], 256  }
 0x237   :  { %365 = vsyncadd [#allocation5], 4294967040 }
 0x238   :  { %243 = vsyncpa [#allocation4], 1 }
 0x239   :  { %244 = vsyncpa [#allocation7], 1 }
 0x23a   :  { %245 = vsyncpa [#allocation5], 1 }

</bundles_post_ra>
